<compile_context>
chip_gen: v5e
topology: v5e:2x2
jax: 0.10.0
libtpu: 0.0.40
codegen_flags: <defaults>
</compile_context>

<pallas_src>
import functools
import math

import jax
import jax.numpy as jnp
from jax.experimental import pallas as pl
from jax.experimental.pallas import tpu as pltpu

# ---------------- configuration (small, consistent with the module) ----------------
IN_CH = 4                 # opt.coarse_volume_channel
MODEL_CH = 32             # opt.model_channels
OUT_CH = IN_CH
NUM_RES_BLOCKS = 1
CHANNEL_MULT = (1, 2, 2, 4)
NUM_HEAD_CHANNELS = 64
RES = 8                   # opt.coarse_volume_resolution
ATTN_RES = (RES // 4, RES // 8)   # attention at these spatial resolutions
ENC_CH = 512              # encoder_channels
TIME_EMB = MODEL_CH * 4
GN_GROUPS = 32
GN_EPS = 1e-5
COND_T = 4                # number of conditioning tokens


# =====================================================================================
# Pallas kernel 1: matmul + bias (+ optional residual, + optional SiLU)
#   bf16 operands, f32 accumulation & epilogue, single whole-array block.
# =====================================================================================
def _mm_kernel(a_ref, w_ref, b_ref, o_ref, *, activation):
    out = jnp.dot(a_ref[...], w_ref[...], preferred_element_type=jnp.float32) + b_ref[...]
    if activation == "silu":
        out = out * jax.nn.sigmoid(out)
    o_ref[...] = out.astype(o_ref.dtype)


def _mm_res_kernel(a_ref, w_ref, b_ref, r_ref, o_ref, *, activation):
    out = (jnp.dot(a_ref[...], w_ref[...], preferred_element_type=jnp.float32)
           + b_ref[...] + r_ref[...])
    if activation == "silu":
        out = out * jax.nn.sigmoid(out)
    o_ref[...] = out.astype(o_ref.dtype)


def matmul_bias(a, w, b=None, activation="none", residual=None, out_dtype=jnp.float32):
    """a: (M, K), w: (K, N) [bf16], b: (N,), residual: (M, N) -> (M, N) in out_dtype.
    All matmuls in this model are tiny (M<=2048, K<=512, N<=3072) so a single
    whole-array block per call minimizes grid-step / launch overhead."""
    a = a.astype(jnp.bfloat16)
    w = w.astype(jnp.bfloat16)
    M, K = a.shape
    K2, N = w.shape
    assert K == K2
    bias = (jnp.zeros((N,), jnp.float32) if b is None else b).astype(jnp.float32).reshape(1, N)

    in_specs = [pl.BlockSpec((M, K), lambda i: (0, 0)),
                pl.BlockSpec((K, N), lambda i: (0, 0)),
                pl.BlockSpec((1, N), lambda i: (0, 0))]
    args = [a, w, bias]
    if residual is None:
        kernel = functools.partial(_mm_kernel, activation=activation)
    else:
        kernel = functools.partial(_mm_res_kernel, activation=activation)
        in_specs.append(pl.BlockSpec((M, N), lambda i: (0, 0)))
        args.append(residual.astype(jnp.float32))

    return pl.pallas_call(
        kernel,
        out_shape=jax.ShapeDtypeStruct((M, N), out_dtype),
        grid_spec=pltpu.PrefetchScalarGridSpec(
            num_scalar_prefetch=0, grid=(1,),
            in_specs=in_specs,
            out_specs=pl.BlockSpec((M, N), lambda i: (0, 0))),
        compiler_params=pltpu.CompilerParams(dimension_semantics=("arbitrary",)),
    )(*args)


# =====================================================================================
# Pallas kernel 2: 3x3x3 conv (padding=1, stride=1) via 27 accumulated shifted matmuls
# over the flattened padded volume.  Activation is read once; no im2col tensor.
# =====================================================================================
def _conv3_kernel(x_ref, w_ref, b_ref, o_ref, acc_ref, *, hpwp, wp):
    m = o_ref.shape[0]
    acc_ref[...] = jnp.zeros_like(acc_ref)

    def body(t, c):
        i = t // 9
        j = (t // 3) % 3
        l = t % 3
        off = i * hpwp + j * wp + l                     # row shift of this tap
        acc_ref[...] += jnp.dot(x_ref[pl.ds(off, m), :], w_ref[t],
                                preferred_element_type=jnp.float32)
        return c

    jax.lax.fori_loop(0, 27, body, 0)
    o_ref[...] = (acc_ref[...] + b_ref[...]).astype(o_ref.dtype)


def conv3x3(x, w, b, out_dtype=jnp.float32):
    """x: (B, D, H, W, Cin) channels-last, w: (27, Cin, Cout) tap-major (i,j,l), b: (Cout,).
    Output (B, D, H, W, Cout).  For output row gr (flattened padded volume), tap (i,j,l)
    reads row gr + i*Hp*Wp + j*Wp + l of the zero-guarded flattened padded activation."""
    B, D, H, W, Cin = x.shape
    Cout = w.shape[-1]
    Dp, Hp, Wp = D + 2, H + 2, W + 2
    P = Dp * Hp * Wp
    maxoff = Hp * Wp + Wp + 1
    xp = jnp.pad(x.astype(jnp.bfloat16), ((0, 0), (1, 1), (1, 1), (1, 1), (0, 0)))
    xx = jnp.pad(xp.reshape(B * P, Cin), ((maxoff, maxoff), (0, 0)))
    M = B * P

    y = pl.pallas_call(
        functools.partial(_conv3_kernel, hpwp=Hp * Wp, wp=Wp),
        out_shape=jax.ShapeDtypeStruct((M, Cout), out_dtype),
        grid_spec=pltpu.PrefetchScalarGridSpec(
            num_scalar_prefetch=0, grid=(1,),
            in_specs=[pl.BlockSpec((M + 2 * maxoff, Cin), lambda i: (0, 0)),
                      pl.BlockSpec((27, Cin, Cout), lambda i: (0, 0, 0)),
                      pl.BlockSpec((1, Cout), lambda i: (0, 0))],
            out_specs=pl.BlockSpec((M, Cout), lambda i: (0, 0)),
            scratch_shapes=[pltpu.VMEM((M, Cout), jnp.float32)]),
        compiler_params=pltpu.CompilerParams(dimension_semantics=("arbitrary",)),
    )(xx, w.astype(jnp.bfloat16), b.astype(jnp.float32).reshape(1, Cout))

    y = y.reshape(B, Dp, Hp, Wp, Cout)[:, 1:-1, 1:-1, 1:-1, :]
    return y


# =====================================================================================
# Pallas kernel 3: fused GroupNorm (+ optional scale/shift) (+ optional SiLU)
# =====================================================================================
def _gn_kernel(x_ref, gamma_ref, beta_ref, scale_ref, shift_ref, proj_ref, o_ref,
               *, eps, apply_silu, inv_n):
    x = x_ref[0].astype(jnp.float32)                 # (S, C)
    proj = proj_ref[...]                             # (C, C) same-group indicator
    ch_sum = jnp.sum(x, axis=0, keepdims=True)       # (1, C)
    mean_c = jnp.dot(ch_sum, proj, preferred_element_type=jnp.float32) * inv_n
    d = x - mean_c
    var_c = jnp.dot(jnp.sum(d * d, axis=0, keepdims=True), proj,
                    preferred_element_type=jnp.float32) * inv_n
    h = d * jax.lax.rsqrt(var_c + eps)
    h = h * gamma_ref[0] + beta_ref[0]
    h = h * (1.0 + scale_ref[0]) + shift_ref[0]
    if apply_silu:
        h = h * jax.nn.sigmoid(h)
    o_ref[0] = h.astype(o_ref.dtype)


_PROJ_CACHE = {}


def _group_proj(C, num_groups):
    if C not in _PROJ_CACHE:
        cg = C // num_groups
        g = jnp.arange(C) // cg
        _PROJ_CACHE[C] = (g[:, None] == g[None, :]).astype(jnp.float32)
    return _PROJ_CACHE[C]


def group_norm(x, gamma, beta, scale=None, shift=None, apply_silu=False,
               num_groups=GN_GROUPS, eps=GN_EPS):
    """x: (B, S, C) f32 or bf16.  scale/shift: optional (B, C) per-sample affine.
    Returns bf16 (B, S, C) ready for the following bf16 matmul/conv."""
    B, S, C = x.shape
    assert C % num_groups == 0
    cg = C // num_groups
    if scale is None:
        scale = jnp.zeros((B, C), jnp.float32)
        shift = jnp.zeros((B, C), jnp.float32)
    proj = _group_proj(C, num_groups)
    inv_n = 1.0 / float(S * cg)

    kernel = functools.partial(_gn_kernel, eps=eps, apply_silu=apply_silu, inv_n=inv_n)
    return pl.pallas_call(
        kernel,
        out_shape=jax.ShapeDtypeStruct((B, S, C), jnp.bfloat16),
        grid_spec=pltpu.PrefetchScalarGridSpec(
            num_scalar_prefetch=0, grid=(B,),
            in_specs=[
                pl.BlockSpec((1, S, C), lambda b: (b, 0, 0)),
                pl.BlockSpec((1, 1, C), lambda b: (0, 0, 0)),
                pl.BlockSpec((1, 1, C), lambda b: (0, 0, 0)),
                pl.BlockSpec((1, 1, C), lambda b: (b, 0, 0)),
                pl.BlockSpec((1, 1, C), lambda b: (b, 0, 0)),
                pl.BlockSpec((C, C), lambda b: (0, 0)),
            ],
            out_specs=pl.BlockSpec((1, S, C), lambda b: (b, 0, 0)),
        ),
        compiler_params=pltpu.CompilerParams(dimension_semantics=("parallel",)),
    )(x, gamma.reshape(1, 1, C).astype(jnp.float32),
      beta.reshape(1, 1, C).astype(jnp.float32),
      scale.reshape(B, 1, C).astype(jnp.float32),
      shift.reshape(B, 1, C).astype(jnp.float32),
      proj)


# =====================================================================================
# Pallas kernel 4: (cross-)attention  softmax(q k^T * scale) v  over all batch*heads
# =====================================================================================
def _attn_kernel(q_ref, k_ref, v_ref, o_ref, *, scale):
    q = q_ref[...].astype(jnp.float32) * scale       # fold the scale into q
    k = k_ref[...].astype(jnp.float32)
    v = v_ref[...].astype(jnp.float32)
    s = jnp.einsum('bqd,bkd->bqk', q, k, preferred_element_type=jnp.float32)
    s = s - jnp.max(s, axis=-1, keepdims=True)
    p = jnp.exp(s)
    inv = pl.reciprocal(jnp.sum(p, axis=-1, keepdims=True), approx=True)
    o = jnp.einsum('bqk,bkd->bqd', p, v, preferred_element_type=jnp.float32)
    o_ref[...] = (o * inv).astype(o_ref.dtype)


def attention(q, k, v, scale):
    """q: (BH, S, dh), k/v: (BH, L, dh) -> bf16 (BH, S, dh).  Single grid step."""
    BH, S, dh = q.shape
    L = k.shape[1]
    return pl.pallas_call(
        functools.partial(_attn_kernel, scale=scale),
        out_shape=jax.ShapeDtypeStruct((BH, S, dh), jnp.bfloat16),
        grid_spec=pltpu.PrefetchScalarGridSpec(
            num_scalar_prefetch=0, grid=(1,),
            in_specs=[
                pl.BlockSpec((BH, S, dh), lambda i: (0, 0, 0)),
                pl.BlockSpec((BH, L, dh), lambda i: (0, 0, 0)),
                pl.BlockSpec((BH, L, dh), lambda i: (0, 0, 0)),
            ],
            out_specs=pl.BlockSpec((BH, S, dh), lambda i: (0, 0, 0)),
        ),
        compiler_params=pltpu.CompilerParams(dimension_semantics=("arbitrary",)),
    )(q, k, v)


# =====================================================================================
# JAX glue: pooling, upsampling, timestep embedding
# =====================================================================================
def avg_pool2(x):
    B, D, H, W, C = x.shape
    return x.reshape(B, D // 2, 2, H // 2, 2, W // 2, 2, C).mean(axis=(2, 4, 6))


def upsample2(x):
    x = jnp.repeat(x, 2, axis=1)
    x = jnp.repeat(x, 2, axis=2)
    x = jnp.repeat(x, 2, axis=3)
    return x


def silu(x):
    return x * jax.nn.sigmoid(x)


def timestep_embedding(t, dim, max_period=10000):
    half = dim // 2
    freqs = jnp.exp(-math.log(max_period) * jnp.arange(half, dtype=jnp.float32) / half)
    args = t.astype(jnp.float32)[:, None] * freqs[None, :]
    return jnp.concatenate([jnp.cos(args), jnp.sin(args)], axis=-1)


# =====================================================================================
# deterministic parameter construction (pre-cast to bf16, matmul layout)
# =====================================================================================
class ParamFactory:
    def __init__(self, seed=0):
        self._key = jax.random.PRNGKey(seed)

    def _next(self):
        self._key, sub = jax.random.split(self._key)
        return sub

    def linear(self, din, dout, scale=None):
        s = (1.0 / math.sqrt(din)) if scale is None else scale
        return {"w": (jax.random.normal(self._next(), (din, dout), jnp.float32) * s
                      ).astype(jnp.bfloat16),
                "b": jax.random.normal(self._next(), (dout,), jnp.float32) * 0.01}

    def conv3(self, cin, cout, scale=None):
        fan = 27 * cin
        s = (1.0 / math.sqrt(fan)) if scale is None else scale
        return {"w": (jax.random.normal(self._next(), (27, cin, cout), jnp.float32) * s
                      ).astype(jnp.bfloat16),
                "b": jax.random.normal(self._next(), (cout,), jnp.float32) * 0.01}

    def conv1(self, cin, cout, scale=None):
        s = (1.0 / math.sqrt(cin)) if scale is None else scale
        return {"w": (jax.random.normal(self._next(), (cin, cout), jnp.float32) * s
                      ).astype(jnp.bfloat16),
                "b": jax.random.normal(self._next(), (cout,), jnp.float32) * 0.01}

    def norm(self, c):
        return {"g": jnp.ones((c,), jnp.float32), "b": jnp.zeros((c,), jnp.float32)}


class _EmbCollector:
    """Batches every resblock's (TIME_EMB -> 2*Cout) projection into one matmul."""
    def __init__(self):
        self.ws, self.bs, self.off = [], [], 0

    def add(self, w, b):
        o = self.off
        self.off += w.shape[1]
        self.ws.append(w)
        self.bs.append(b)
        return o


def make_res(pf, emb_col, cin, cout, up=False, down=False):
    ew = pf.linear(TIME_EMB, 2 * cout)                # scale-shift norm projection
    return {"in_norm": pf.norm(cin),
            "in_conv": pf.conv3(cin, cout),
            "emb_off": emb_col.add(ew["w"], ew["b"]),
            "out_norm": pf.norm(cout),
            # zero_module in the original UNet; small random here for a non-trivial output
            "out_conv": pf.conv3(cout, cout, scale=0.02),
            "up": up, "down": down,
            "skip": pf.conv1(cin, cout) if cin != cout else None}


def make_attn(pf, ch):
    heads = max(1, ch // NUM_HEAD_CHANNELS)
    return {"norm": pf.norm(ch),
            "qkv": pf.linear(ch, 3 * ch),
            "enc_kv": pf.linear(ENC_CH, 2 * ch),
            "proj": pf.linear(ch, ch, scale=0.02),    # zero_module in original
            "heads": heads}


def build_params():
    pf = ParamFactory(0)
    emb_col = _EmbCollector()
    p = {"time1": pf.linear(MODEL_CH, TIME_EMB),
         "time2": pf.linear(TIME_EMB, TIME_EMB)}

    input_blocks = [[{"type": "in_conv", "p": pf.conv3(IN_CH, MODEL_CH)}]]
    ch = MODEL_CH
    chans = [ch]
    cur = RES
    for level, mult in enumerate(CHANNEL_MULT):
        for _ in range(NUM_RES_BLOCKS):
            layers = [{"type": "res", "p": make_res(pf, emb_col, ch, mult * MODEL_CH)}]
            ch = mult * MODEL_CH
            if cur in ATTN_RES:
                layers.append({"type": "attn", "p": make_attn(pf, ch)})
            input_blocks.append(layers)
            chans.append(ch)
        if level != len(CHANNEL_MULT) - 1:
            input_blocks.append([{"type": "res", "p": make_res(pf, emb_col, ch, ch, down=True)}])
            chans.append(ch)
            cur //= 2
    p["input_blocks"] = input_blocks

    p["middle"] = [{"type": "res", "p": make_res(pf, emb_col, ch, ch)},
                   {"type": "attn", "p": make_attn(pf, ch)},
                   {"type": "res", "p": make_res(pf, emb_col, ch, ch)}]

    output_blocks = []
    for level, mult in list(enumerate(CHANNEL_MULT))[::-1]:
        for i in range(NUM_RES_BLOCKS + 1):
            ich = chans.pop()
            layers = [{"type": "res", "p": make_res(pf, emb_col, ch + ich, mult * MODEL_CH)}]
            ch = mult * MODEL_CH
            if cur in ATTN_RES:
                layers.append({"type": "attn", "p": make_attn(pf, ch)})
            if level and i == NUM_RES_BLOCKS:
                layers.append({"type": "res", "p": make_res(pf, emb_col, ch, ch, up=True)})
                cur *= 2
            output_blocks.append(layers)
    p["output_blocks"] = output_blocks

    p["out_norm"] = pf.norm(ch)
    p["out_conv"] = pf.conv3(ch, OUT_CH, scale=0.02)  # zero_module in original
    p["emb_w"] = jnp.concatenate(emb_col.ws, axis=1)  # (TIME_EMB, sum 2*Cout) bf16
    p["emb_b"] = jnp.concatenate(emb_col.bs)
    return p


# =====================================================================================
# UNet forward (composing the Pallas kernels)
# =====================================================================================
def resblock_fwd(p, x, emb_all):
    B, D, H, W, C = x.shape
    h = group_norm(x.reshape(B, D * H * W, C), p["in_norm"]["g"], p["in_norm"]["b"],
                   apply_silu=True).reshape(B, D, H, W, C)          # bf16
    if p["down"]:
        h = avg_pool2(h)
        x = avg_pool2(x)
    elif p["up"]:
        h = upsample2(h)
        x = upsample2(x)
    h = conv3x3(h, p["in_conv"]["w"], p["in_conv"]["b"], out_dtype=jnp.bfloat16)
    B2, D2, H2, W2, Cout = h.shape
    S2 = D2 * H2 * W2

    off = p["emb_off"]
    eo = emb_all[:, off: off + 2 * Cout]                            # (B, 2*Cout) f32
    scale, shift = eo[:, :Cout], eo[:, Cout:]

    h = group_norm(h.reshape(B2, S2, Cout), p["out_norm"]["g"], p["out_norm"]["b"],
                   scale=scale, shift=shift, apply_silu=True)
    h = conv3x3(h.reshape(B2, D2, H2, W2, Cout), p["out_conv"]["w"], p["out_conv"]["b"],
                out_dtype=jnp.float32)                              # f32 (residual stream)

    if p["skip"] is not None:
        # fuse the residual add (+h) into the 1x1 skip-conv matmul epilogue
        out = matmul_bias(x.reshape(B2 * S2, C), p["skip"]["w"], p["skip"]["b"],
                          residual=h.reshape(B2 * S2, Cout))
        return out.reshape(B2, D2, H2, W2, Cout)
    return x + h


def attnblock_fwd(p, x, cond_t):
    B, D, H, W, C = x.shape
    S = D * H * W
    heads = p["heads"]
    dh = C // heads
    xn = group_norm(x.reshape(B, S, C), p["norm"]["g"], p["norm"]["b"], apply_silu=False)
    qkv = matmul_bias(xn.reshape(B * S, C), p["qkv"]["w"], p["qkv"]["b"])
    qkv = qkv.reshape(B, S, 3, heads, dh)
    q = jnp.transpose(qkv[:, :, 0], (0, 2, 1, 3)).reshape(B * heads, S, dh)
    k = jnp.transpose(qkv[:, :, 1], (0, 2, 1, 3)).reshape(B * heads, S, dh)
    v = jnp.transpose(qkv[:, :, 2], (0, 2, 1, 3)).reshape(B * heads, S, dh)

    T = cond_t.shape[1]
    ekv = matmul_bias(cond_t.reshape(B * T, ENC_CH), p["enc_kv"]["w"], p["enc_kv"]["b"])
    ekv = ekv.reshape(B, T, 2, heads, dh)
    ek = jnp.transpose(ekv[:, :, 0], (0, 2, 1, 3)).reshape(B * heads, T, dh)
    ev = jnp.transpose(ekv[:, :, 1], (0, 2, 1, 3)).reshape(B * heads, T, dh)

    kf = jnp.concatenate([ek, k], axis=1)
    vf = jnp.concatenate([ev, v], axis=1)
    a = attention(q, kf, vf, 1.0 / math.sqrt(dh))                   # bf16 (BH, S, dh)
    a = jnp.transpose(a.reshape(B, heads, S, dh), (0, 2, 1, 3)).reshape(B * S, C)
    # fuse the residual add (+x) into the output-projection matmul epilogue
    h = matmul_bias(a, p["proj"]["w"], p["proj"]["b"], residual=x.reshape(B * S, C))
    return h.reshape(B, D, H, W, C)


def unet_forward(params, x, t, cond):
    """x: (B, C, D, H, W)  t: (B,) int  cond: (B, ENC_CH, T)  ->  (B, C, D, H, W)."""
    h = jnp.transpose(x, (0, 2, 3, 4, 1)).astype(jnp.float32)       # to channels-last
    cond_t = jnp.transpose(cond, (0, 2, 1)).astype(jnp.float32)     # (B, T, ENC_CH)

    temb = timestep_embedding(t, MODEL_CH)
    emb = matmul_bias(temb, params["time1"]["w"], params["time1"]["b"], activation="silu")
    emb = matmul_bias(emb, params["time2"]["w"], params["time2"]["b"])
    emb_silu = silu(emb)                                            # tiny glue
    # every resblock's timestep projection in ONE matmul
    emb_all = matmul_bias(emb_silu, params["emb_w"], params["emb_b"])

    def run(layer, h):
        if layer["type"] == "in_conv":
            return conv3x3(h, layer["p"]["w"], layer["p"]["b"], out_dtype=jnp.float32)
        if layer["type"] == "res":
            return resblock_fwd(layer["p"], h, emb_all)
        return attnblock_fwd(layer["p"], h, cond_t)

    hs = []
    for stage in params["input_blocks"]:
        for layer in stage:
            h = run(layer, h)
        hs.append(h)
    for layer in params["middle"]:
        h = run(layer, h)
    for stage in params["output_blocks"]:
        h = jnp.concatenate([h, hs.pop()], axis=-1)
        for layer in stage:
            h = run(layer, h)

    B, D, H_, W, C = h.shape
    h = group_norm(h.reshape(B, D * H_ * W, C), params["out_norm"]["g"],
                   params["out_norm"]["b"], apply_silu=True).reshape(B, D, H_, W, C)
    h = conv3x3(h, params["out_conv"]["w"], params["out_conv"]["b"], out_dtype=jnp.float32)
    return jnp.transpose(h, (0, 4, 1, 2, 3))                        # back to NCDHW


# =====================================================================================
if __name__ == "__main__":
    key = jax.random.PRNGKey(0)
    kx, kt, kc = jax.random.split(key, 3)
    B = 2
    x = jax.random.normal(kx, (B, IN_CH, RES, RES, RES), jnp.float32)
    t = jax.random.randint(kt, (B,), 0, 1000)
    cond = jax.random.normal(kc, (B, ENC_CH, COND_T), jnp.float32)

    # TODO(synk): load_ckpt / EMA shadow-param loading has no Pallas equivalent (file IO);
    # parameters are deterministic in-script instead.
    params = build_params()
    out = unet_forward(params, x, t, cond)
    out = jax.block_until_ready(out)

    assert out.shape == (B, OUT_CH, RES, RES, RES), out.shape
    assert bool(jnp.all(jnp.isfinite(out)))
    print("KERNEL_OK")
</pallas_src>

<mosaic_0001>
module attributes {stable_mosaic.version = 11 : i64} {
  func.func @_mm_kernel(%arg0: i32, %arg1: memref<2x32xbf16, #tpu.memory_space<vmem>>, %arg2: memref<32x128xbf16, #tpu.memory_space<vmem>>, %arg3: memref<1x128xf32, #tpu.memory_space<vmem>>, %arg4: memref<2x128xf32, #tpu.memory_space<vmem>>) attributes {dimension_semantics = [#tpu.dimension_semantics<arbitrary>], iteration_bounds = array<i64: 1>, scalar_prefetch = 0 : i64, scratch_operands = 0 : i64, tpu.core_type = #tpu.core_type<tc>, window_params = [{pipeline_mode = #tpu.pipeline_mode<synchronous>, transform_indices = @transform_0, window_bounds = array<i64: 2, 32>}, {pipeline_mode = #tpu.pipeline_mode<synchronous>, transform_indices = @transform_1, window_bounds = array<i64: 32, 128>}, {pipeline_mode = #tpu.pipeline_mode<synchronous>, transform_indices = @transform_2, window_bounds = array<i64: 1, 128>}, {pipeline_mode = #tpu.pipeline_mode<synchronous>, transform_indices = @transform_3, window_bounds = array<i64: 2, 128>}]} {
    %c0 = arith.constant 0 : index
    %c0_0 = arith.constant 0 : index
    %0 = vector.load %arg1[%c0, %c0_0] : memref<2x32xbf16, #tpu.memory_space<vmem>>, vector<2x32xbf16>
    %c0_1 = arith.constant 0 : index
    %c0_2 = arith.constant 0 : index
    %1 = vector.load %arg2[%c0_1, %c0_2] : memref<32x128xbf16, #tpu.memory_space<vmem>>, vector<32x128xbf16>
    %cst = arith.constant dense<0.000000e+00> : vector<2x128xf32>
    %2 = tpu.matmul %0, %1, %cst {dimension_numbers = #tpu.dot_dimension_numbers<[1], [0], [0], [1], [0, 0, 1, 1], [], []>} : vector<2x32xbf16>, vector<32x128xbf16>, vector<2x128xf32> -> vector<2x128xf32>
    %c0_3 = arith.constant 0 : index
    %c0_4 = arith.constant 0 : index
    %3 = vector.load %arg3[%c0_3, %c0_4] : memref<1x128xf32, #tpu.memory_space<vmem>>, vector<1x128xf32>
    %4 = vector.broadcast %3 : vector<1x128xf32> to vector<2x128xf32>
    %5 = arith.addf %2, %4 : vector<2x128xf32>
    %6 = arith.negf %5 : vector<2x128xf32>
    %7 = math.exp %6 : vector<2x128xf32>
    %cst_5 = arith.constant 1.000000e+00 : f32
    %8 = vector.broadcast %cst_5 : f32 to vector<2x128xf32>
    %9 = arith.addf %8, %7 : vector<2x128xf32>
    %10 = arith.divf %8, %9 : vector<2x128xf32>
    %11 = arith.mulf %5, %10 : vector<2x128xf32>
    %c0_6 = arith.constant 0 : index
    %c0_7 = arith.constant 0 : index
    %12 = vector.load %arg4[%c0_6, %c0_7] : memref<2x128xf32, #tpu.memory_space<vmem>>, vector<2x128xf32>
    tpu.vector_store %arg4[%c0_6, %c0_7], %11 {strides = array<i32>} : memref<2x128xf32, #tpu.memory_space<vmem>>, vector<2x128xf32>,
    return
  }
  func.func @transform_0(%arg0: i32) -> (i32, i32) {
    %c0_i32 = arith.constant 0 : i32
    %c0_i32_0 = arith.constant 0 : i32
    %c0_i32_1 = arith.constant 0 : i32
    return %c0_i32, %c0_i32_0 : i32, i32
  }
  func.func @transform_1(%arg0: i32) -> (i32, i32) {
    %c0_i32 = arith.constant 0 : i32
    %c0_i32_0 = arith.constant 0 : i32
    %c0_i32_1 = arith.constant 0 : i32
    return %c0_i32, %c0_i32_0 : i32, i32
  }
  func.func @transform_2(%arg0: i32) -> (i32, i32) {
    %c0_i32 = arith.constant 0 : i32
    %c0_i32_0 = arith.constant 0 : i32
    %c0_i32_1 = arith.constant 0 : i32
    return %c0_i32, %c0_i32_0 : i32, i32
  }
  func.func @transform_3(%arg0: i32) -> (i32, i32) {
    %c0_i32 = arith.constant 0 : i32
    %c0_i32_0 = arith.constant 0 : i32
    %c0_i32_1 = arith.constant 0 : i32
    return %c0_i32, %c0_i32_0 : i32, i32
  }
}

</mosaic_0001>

<bundles_post_ra>
// kernel: tpu_custom_call.1
= control target key start
LH: loop header
LB: loop body
LE: loop exit
PB: predicated region body
PF: predicated region fallthrough
CT: control target
= control target key end

     0   :  { %8 = vsyncpa [#allocation3], 0  ;;  %s260_s0 = inlined_call_operand.hbm [shape: bf16[2,32], index: 0, kind: input, shape index: {}]   ;;  %s261_s1 = inlined_call_operand.hbm [shape: bf16[32,128], index: 1, kind: input, shape index: {}]   ;;  %s262_s2 = inlined_call_operand.vmem [shape: f32[1,128], index: 2, kind: input, shape index: {}]   ;;  %s263_s3 = inlined_call_operand.hbm [shape: f32[2,128], index: 3, kind: output, shape index: {}]  }
   0x1   :  { %9 = vsyncpa [#allocation6], 0 }
   0x2   :  { %10 = vsyncpa [#allocation4], 0  ;;  %s16_s14 = sshll.u32 %s260_s0, 4  ;;  %s223_s15 = smov [#allocation2]   ;;  %s17_s14 = int_to_ptr.hbm [resolvable:$true] %s16_s14 }
   0x3   :  { %s18_s16 = sshll.u32 %s223_s15, 4  ;;  %s26_s19 = sshll.u32 %s261_s1, 4  ;;  %s19_s16 = int_to_ptr.vmem [resolvable:$true] %s18_s16  ;;  %s27_s19 = int_to_ptr.hbm [resolvable:$true] %s26_s19 }
   0x4   :  { %21 = dma.hbm_to_vmem [thread:$0]  %s17_s14, 16, %s19_s16, [#allocation3]  }
   0x5   :  { %s224_s20 = smov [#allocation5]   ;;  %s225_s22 = smov 64  }
   0x6   :  { %s28_s21 = sshll.u32 %s224_s20, 4  ;;  %s226_s23 = smov 4   ;;  %s29_s21 = int_to_ptr.vmem [resolvable:$true] %s28_s21 }
   0x7   :  { %34 = dma.hbm_to_vmem [thread:$0]  %s27_s19, 256, %s29_s21, [#allocation6], %s225_s22, %s225_s22, %s226_s23  }
   0x8   :  { %217 = dma.done.wait [#allocation3], 16  }
   0x9   :  { %218 = vsyncadd [#allocation3], 4294967280 }
   0xa   :  { %219 = dma.done.wait [#allocation6], 256  }
   0xb   :  { %220 = vsyncadd [#allocation6], 4294967040  ;;  %v134_v0 = vld [vmem:[#allocation5 + $0x8] sm:$0xff]  ;;  %v133_v1 = vld [vmem:[#allocation5] sm:$0xff]  ;;  %vm67_vm0 = vcmask 261120   ;;  %s112_s27 = sshll.u32 %s263_s3, 4  ;;  %s113_s27 = int_to_ptr.hbm [resolvable:$true] %s112_s27 }
   0xc   :  { %77 = vmatpush.bf16.msra.mxu0 %v134_v0  ;;  %v46_v2 = vld [vmem:[#allocation2] sm:$0x1] }
   0xd   :  { %v140_v3 = vld [vmem:[%s262_s2] ss:$0 sm:$0xff]  ;;  %s227_s2 = smov [#allocation7]  }
   0xe   :  { %s110_s24 = sshll.u32 %s227_s2, 4  ;;  %s111_s24 = int_to_ptr.vmem [resolvable:$true] %s110_s24 }
  0x10   :  { %78 = vmatpush.bf16.msra.mxu0 %v133_v1 }
  0x13   :  { %131 = vmatmul.msk.bf16.vlgmr.msra.gmra.mxu0 %vm67_vm0, %v46_v2 }
  0x90   :  { %v80_v4 = vpop.f32.mrf.mxu0 }
  0x91   :  { %v81_v5 = vadd.f32 %v140_v3, %v80_v4 }
  0x93   :  { %v132_v6 = vmul.f32 -1.442695, %v81_v5 }
  0x95   :  { %141 = vpow2.f32 %v132_v6 }
  0x98   :  { %v82_v7 = vpop.f32.mrf.mxu0 }
  0x9b   :  { %v142_v8 = vpop.eup %141 }
  0x9c   :  { %v87_v9 = vadd.f32 1.0, %v142_v8 }
  0x9e   :  { %143 = vrcp.f32 %v87_v9  ;;  %v99_v13 = vand.u32 2147483648, %v87_v9  ;;  %v97_v15 = vand.u32 2147483647, %v87_v9  ;;  %vm93_vm2 = vweird.f32 %v87_v9 }
  0xa0   :  { %v100_v17 = vor.u32 1.1754944e-38, %v99_v13  ;;  %vm98_vm4 = vcmp.eq.f32.partialorder %v97_v15, 8.507059e+37 }
  0xa4   :  { %v144_v10 = vpop.eup %143 }
  0xa5   :  { %v89_v11 = vmul.f32 %v144_v10, %v87_v9  ;;  %vm94_vm1 = vweird.f32 %v144_v10 }
  0xa6   :  { %vm95_vm3 = vmor %vm93_vm2, %vm94_vm1 }
  0xa7   :  { %v90_v12 = vsub.f32 1.0, %v89_v11 }
  0xa9   :  { %v91_v14 = vmul.f32 %v144_v10, %v90_v12 }
  0xab   :  { %v92_v16 = vadd.f32 %v144_v10, %v91_v14 }
  0xad   :  { %v96_v18 = vsel %vm95_vm3, %v144_v10, %v92_v16 }
  0xae   :  { %v101_v19 = vsel %vm98_vm4, %v100_v17, %v96_v18 }
  0xaf   :  { %v103_v20 = vmul.f32 %v101_v19, %v81_v5 }
  0xb1   :  { %104 = vst [vmem:[#allocation7] sm:$0x3] %v103_v20 }
  0xb2   :  { %115 = dma.vmem_to_hbm [thread:$0]  %s111_s24, 32, %s113_s27, [#allocation4]  }
  0xb3   :  { %221 = dma.done.wait [#allocation4], 32  }
  0xb4   :  { %222 = vsyncadd [#allocation4], 4294967264 }
  0xb5   :  { %120 = vsyncpa [#allocation3], 1 }
  0xb6   :  { %121 = vsyncpa [#allocation6], 1 }
  0xb7   :  { %122 = vsyncpa [#allocation4], 1 }

</bundles_post_ra>
